<compile_context>
chip_gen: v7x
topology: tpu7x:2x2x1
jax: 0.10.0
libtpu: 0.0.40
codegen_flags: <defaults>
</compile_context>

<pallas_src>
import jax
import jax.numpy as jnp
from jax.experimental import pallas as pl
from jax.experimental.pallas import tpu as pltpu


# ----------------------------- Pallas kernel --------------------------------

def _irisnet_fused_kernel(x_ref, f_ref, w_ref, b_ref, o_ref, r_ref):
    # Identity path: module output == input.  x is viewed as a lane-dense
    # [tb, C*H*W] slab; the output aliases the input buffer (input_output_aliases).
    o_ref[...] = x_ref[...]

    # Collapsed fc head: Dropout(eval) + Linear(2048->1024)->Linear(1024->256)->
    # Linear(256->8) == feats @ W_eff + b_eff (single MXU matmul).  Its result is
    # discarded by the caller, exactly like `resx` in the reference forward.
    r_ref[...] = (
        jnp.dot(f_ref[...], w_ref[...], preferred_element_type=jnp.float32)
        + b_ref[...]
    ).astype(r_ref.dtype)


# ------------------------------ JAX wrappers ---------------------------------

def _choose_batch_tile(B, P, K, itemsize, vmem_budget_bytes=6 << 20):
    """Largest batch tile (multiple of 8, or B itself when B <= 8) whose
    double-buffered x/out/feat slabs fit a conservative VMEM budget."""
    if B <= 8:
        return B
    # 2 buffers each for x-in, identity-out, feats-in.
    bytes_per_row = (2 * P + P + K) * itemsize * 2
    max_rows = max(8, vmem_budget_bytes // max(bytes_per_row, 1))
    tb = min(B, (max_rows // 8) * 8)
    return max(tb, 8)


def irisnet_forward(x, feats, w_eff, b_eff):
    """IrisNet.forward: returns x unchanged (the module's true output) plus the
    dead fc-head result (mirrors `resx`, discarded by the reference)."""
    B = x.shape[0]
    x2 = x.reshape(B, -1)                 # lane-dense [B, C*H*W]
    P = x2.shape[1]
    K, O = w_eff.shape                    # (2048, 8)

    tb = _choose_batch_tile(B, P, K, x2.dtype.itemsize)
    grid = (pl.cdiv(B, tb),)              # partial last block is masked on store

    out2, resx = pl.pallas_call(
        _irisnet_fused_kernel,
        out_shape=(
            jax.ShapeDtypeStruct((B, P), x2.dtype),        # identity output
            jax.ShapeDtypeStruct((B, O), jnp.float32),     # dead head output
        ),
        grid=grid,
        in_specs=[
            pl.BlockSpec((tb, P), lambda i: (i, 0)),       # x slab (lane-dense)
            pl.BlockSpec((tb, K), lambda i: (i, 0)),       # features
            pl.BlockSpec((K, O), lambda i: (0, 0)),        # collapsed weight (64 KiB, fetched once)
            pl.BlockSpec((1, O), lambda i: (0, 0)),        # collapsed bias
        ],
        out_specs=(
            pl.BlockSpec((tb, P), lambda i: (i, 0)),
            pl.BlockSpec((tb, O), lambda i: (i, 0)),
        ),
        input_output_aliases={0: 0},                       # identity output reuses x slab
        compiler_params=pltpu.CompilerParams(
            dimension_semantics=("parallel",),
        ),
    )(x2, feats, w_eff, b_eff)

    return out2.reshape(x.shape), resx


def init_head_params(key):
    """fc head params stored as (in, out), plus the exact collapsed affine map."""
    k1, k2, k3 = jax.random.split(key, 3)
    w1 = jax.random.normal(k1, (2048, 1024), jnp.float32) * 0.02
    b1 = jnp.zeros((1, 1024), jnp.float32)
    w2 = jax.random.normal(k2, (1024, 256), jnp.float32) * 0.02
    b2 = jnp.zeros((1, 256), jnp.float32)
    w3 = jax.random.normal(k3, (256, 8), jnp.float32) * 0.02
    b3 = jnp.zeros((1, 8), jnp.float32)

    # Dropout(eval)=identity and three activation-free Linears fold exactly:
    w_eff = w1 @ w2 @ w3                       # (2048, 8)
    b_eff = (b1 @ w2 + b2) @ w3 + b3           # (1, 8)
    return (w1, b1, w2, b2, w3, b3), (w_eff, b_eff)


# ---------------------------------- main --------------------------------------

if __name__ == "__main__":
    key = jax.random.PRNGKey(0)
    kx, kf, kp = jax.random.split(key, 3)

    # Small NCHW input consistent with a resnet50-style image model.
    B, C, H, W = 2, 3, 32, 32
    x = jax.random.normal(kx, (B, C, H, W), jnp.float32)

    # Deterministic synthetic 2048-d features standing in for the backbone output.
    feats = jax.random.normal(kf, (B, 2048), jnp.float32)

    (w1, b1, w2, b2, w3, b3), (w_eff, b_eff) = init_head_params(kp)

    out, resx = irisnet_forward(x, feats, w_eff, b_eff)
    out = jax.block_until_ready(out)
    resx = jax.block_until_ready(resx)

    # The module's forward returns its input unchanged.
    assert out.shape == x.shape and out.dtype == x.dtype
    assert bool(jnp.allclose(out, x)), "identity forward mismatch"
    assert resx.shape == (B, 8)

    # Validate the algebraic collapse against the explicit 3-Linear chain.
    ref = ((feats @ w1 + b1) @ w2 + b2) @ w3 + b3
    assert bool(jnp.allclose(resx, ref, atol=1e-3, rtol=1e-3)), "fc-head collapse mismatch"

    print("KERNEL_OK")
</pallas_src>

<mosaic_0001>
module attributes {stable_mosaic.version = 11 : i64} {
  func.func @_irisnet_fused_kernel(%arg0: i32, %arg1: memref<2x3072xf32, #tpu.memory_space<vmem>>, %arg2: memref<2x2048xf32, #tpu.memory_space<vmem>>, %arg3: memref<2048x8xf32, #tpu.memory_space<vmem>>, %arg4: memref<1x8xf32, #tpu.memory_space<vmem>>, %arg5: memref<2x3072xf32, #tpu.memory_space<vmem>>, %arg6: memref<2x8xf32, #tpu.memory_space<vmem>>) attributes {dimension_semantics = [#tpu.dimension_semantics<parallel>], iteration_bounds = array<i64: 1>, scalar_prefetch = 0 : i64, scratch_operands = 0 : i64, tpu.core_type = #tpu.core_type<tc>, window_params = [{transform_indices = @transform_0, window_bounds = array<i64: 2, 3072>}, {transform_indices = @transform_1, window_bounds = array<i64: 2, 2048>}, {pipeline_mode = #tpu.pipeline_mode<synchronous>, transform_indices = @transform_2, window_bounds = array<i64: 2048, 8>}, {pipeline_mode = #tpu.pipeline_mode<synchronous>, transform_indices = @transform_3, window_bounds = array<i64: 1, 8>}, {transform_indices = @transform_4, window_bounds = array<i64: 2, 3072>}, {transform_indices = @transform_5, window_bounds = array<i64: 2, 8>}]} {
    %c0 = arith.constant 0 : index
    %c0_0 = arith.constant 0 : index
    %0 = vector.load %arg1[%c0, %c0_0] : memref<2x3072xf32, #tpu.memory_space<vmem>>, vector<2x3072xf32>
    %c0_1 = arith.constant 0 : index
    %c0_2 = arith.constant 0 : index
    %1 = vector.load %arg5[%c0_1, %c0_2] : memref<2x3072xf32, #tpu.memory_space<vmem>>, vector<2x3072xf32>
    tpu.vector_store %arg5[%c0_1, %c0_2], %0 {strides = array<i32>} : memref<2x3072xf32, #tpu.memory_space<vmem>>, vector<2x3072xf32>,
    %c0_3 = arith.constant 0 : index
    %c0_4 = arith.constant 0 : index
    %2 = vector.load %arg2[%c0_3, %c0_4] : memref<2x2048xf32, #tpu.memory_space<vmem>>, vector<2x2048xf32>
    %c0_5 = arith.constant 0 : index
    %c0_6 = arith.constant 0 : index
    %3 = vector.load %arg3[%c0_5, %c0_6] : memref<2048x8xf32, #tpu.memory_space<vmem>>, vector<2048x8xf32>
    %cst = arith.constant dense<0.000000e+00> : vector<2x8xf32>
    %4 = tpu.matmul %2, %3, %cst {dimension_numbers = #tpu.dot_dimension_numbers<[1], [0], [0], [1], [0, 0, 1, 1], [], []>} : vector<2x2048xf32>, vector<2048x8xf32>, vector<2x8xf32> -> vector<2x8xf32>
    %c0_7 = arith.constant 0 : index
    %c0_8 = arith.constant 0 : index
    %5 = vector.load %arg4[%c0_7, %c0_8] : memref<1x8xf32, #tpu.memory_space<vmem>>, vector<1x8xf32>
    %6 = vector.broadcast %5 : vector<1x8xf32> to vector<2x8xf32>
    %7 = arith.addf %4, %6 : vector<2x8xf32>
    %c0_9 = arith.constant 0 : index
    %c0_10 = arith.constant 0 : index
    %8 = vector.load %arg6[%c0_9, %c0_10] : memref<2x8xf32, #tpu.memory_space<vmem>>, vector<2x8xf32>
    tpu.vector_store %arg6[%c0_9, %c0_10], %7 {strides = array<i32>} : memref<2x8xf32, #tpu.memory_space<vmem>>, vector<2x8xf32>,
    return
  }
  func.func @transform_0(%arg0: i32) -> (i32, i32) {
    %c0_i32 = arith.constant 0 : i32
    %c0_i32_0 = arith.constant 0 : i32
    return %arg0, %c0_i32 : i32, i32
  }
  func.func @transform_1(%arg0: i32) -> (i32, i32) {
    %c0_i32 = arith.constant 0 : i32
    %c0_i32_0 = arith.constant 0 : i32
    return %arg0, %c0_i32 : i32, i32
  }
  func.func @transform_2(%arg0: i32) -> (i32, i32) {
    %c0_i32 = arith.constant 0 : i32
    %c0_i32_0 = arith.constant 0 : i32
    %c0_i32_1 = arith.constant 0 : i32
    return %c0_i32, %c0_i32_0 : i32, i32
  }
  func.func @transform_3(%arg0: i32) -> (i32, i32) {
    %c0_i32 = arith.constant 0 : i32
    %c0_i32_0 = arith.constant 0 : i32
    %c0_i32_1 = arith.constant 0 : i32
    return %c0_i32, %c0_i32_0 : i32, i32
  }
  func.func @transform_4(%arg0: i32) -> (i32, i32) {
    %c0_i32 = arith.constant 0 : i32
    %c0_i32_0 = arith.constant 0 : i32
    return %arg0, %c0_i32 : i32, i32
  }
  func.func @transform_5(%arg0: i32) -> (i32, i32) {
    %c0_i32 = arith.constant 0 : i32
    %c0_i32_0 = arith.constant 0 : i32
    return %arg0, %c0_i32 : i32, i32
  }
}

</mosaic_0001>

<bundles_post_ra>
// kernel: tpu_custom_call.1
= control target key start
LH: loop header
LB: loop body
LE: loop exit
PB: predicated region body
PF: predicated region fallthrough
CT: control target
= control target key end

     0   :  { %11 = vsyncpa [#allocation3], 0  ;;  %s2501_s0 = inlined_call_operand.hbm [shape: f32[2,3072], index: 0, kind: input, shape index: {}, may-alias: {0,4}]   ;;  %s2502_s1 = inlined_call_operand.vmem [shape: f32[2,2048], index: 1, kind: input, shape index: {}]   ;;  %s2503_s2 = inlined_call_operand.vmem [shape: f32[2048,8], index: 2, kind: input, shape index: {}]   ;;  %s2504_s3 = inlined_call_operand.vmem [shape: f32[1,8], index: 3, kind: input, shape index: {}]   ;;  %s2505_s4 = inlined_call_operand.hbm [shape: f32[2,3072], index: 4, kind: output, shape index: {0}, may-alias: {0,4}]   ;;  %s2506_s5 = inlined_call_operand.hbm [shape: f32[2,8], index: 5, kind: output, shape index: {1}]  }
   0x1   :  { %12 = vsyncpa [#allocation4], 0 }
   0x2   :  { %13 = vsyncpa [#allocation7], 0  ;;  %s1608_s18 = smov [#allocation2]   ;;  %s1536_s22 = scalar_lea.hbm %s2501_s0, 768 }
   0x3   :  { %s20_s19 = sshll.u32 %s1608_s18, 4  ;;  %p1537_p0 = scmp.ne.s32.totalorder %s2501_s0, %s1536_s22  ;;  %s21_s19 = int_to_ptr.vmem [resolvable:$true] %s20_s19 }
   0x4   :  { %p1540_p1 = scmp.lt.u32.totalorder %s1536_s22, %s2501_s0 }
   0x6   :  { %p1542_p2 = pnand %p1540_p1, %p1537_p0 }
   0x8   :  { %1545 = shalt.err (!%p1542_p2)
}
   0x9   :  { %s1546_s27 = scalar_lea.vmem %s21_s19, 768  ;;  %p1551_p4 = scmp.lt.s32.totalorder %s21_s19, %s21_s19 }
   0xa   :  { %p1547_p3 = scmp.ne.s32.totalorder %s21_s19, %s1546_s27  ;;  %p1552_p5 = scmp.lt.s32.totalorder %s1546_s27, %s1546_s27 }
   0xc   :  { %p1553_p6 = por %p1552_p5, %p1551_p4 }
   0xe   :  { %p1554_p7 = pnand %p1553_p6, %p1547_p3 }
  0x10   :  { %1557 = shalt.err (!%p1554_p7)
}
  0x11   :  { %23 = dma.hbm_to_vmem [thread:$0]  %s2501_s0, 768, %s21_s19, [#allocation3]  }
  0x12   :  { %1602 = dma.done.wait [#allocation3], 768  }
  0x13   :  { %1603 = vsyncadd [#allocation3], 4294966528  ;;  %v65_v0 = vld [vmem:[%s2503_s2 + $0x80] sm:$0xff]  ;;  %v66_v1 = vld [vmem:[%s2503_s2 + $0x88] sm:$0xff]  ;;  %v1609_v47 = vmov 1983009808   ;;  %v320_v49 = vlaneseq }
  0x14   :  { %v49_v2 = vld [vmem:[%s2503_s2] sm:$0xff]  ;;  %v1272_v3 = vpack.c.bf16 %v66_v1, %v65_v0  ;;  %v50_v4 = vld [vmem:[%s2503_s2 + $0x8] sm:$0xff]  ;;  %v67_v11 = vld [vmem:[%s2503_s2 + $0x90] sm:$0xff]  ;;  %v318_v48 = vunpack.c.l.s4 %v1609_v47 }
  0x15   :  { %v97_v5 = vld [vmem:[%s2503_s2 + $0x180] sm:$0xff]  ;;  %v98_v6 = vld [vmem:[%s2503_s2 + $0x188] sm:$0xff]  ;;  %v1274_v7 = vpack.c.bf16 %v50_v4, %v49_v2  ;;  %v68_v13 = vld [vmem:[%s2503_s2 + $0x98] sm:$0xff]  ;;  %v321_v0 = vshrl.u32 %v320_v49, 7 }
  0x16   :  { %v1304_v8 = vpack.c.bf16 %v98_v6, %v97_v5  ;;  %v81_v9 = vld [vmem:[%s2503_s2 + $0x100] sm:$0xff]  ;;  %v82_v10 = vld [vmem:[%s2503_s2 + $0x108] sm:$0xff]  ;;  %1273 = vmatprep.subr.bf16.mxu0 %v1272_v3  ;;  %v51_v14 = vld [vmem:[%s2503_s2 + $0x10] sm:$0xff]  ;;  %v1276_v16 = vpack.c.bf16 %v68_v13, %v67_v11  ;;  %v319_v63 = vunpack.c.0.s8 %v318_v48 }
  0x17   :  { %v1306_v12 = vpack.c.bf16 %v82_v10, %v81_v9  ;;  %v52_v15 = vld [vmem:[%s2503_s2 + $0x18] sm:$0xff]  ;;  %1275 = vmatpush3.bf16.msra.mxu0 %v1274_v7  ;;  %v99_v18 = vld [vmem:[%s2503_s2 + $0x190] sm:$0xff]  ;;  %v69_v23 = vld [vmem:[%s2503_s2 + $0xa0] sm:$0xff] }
  0x18   :  { %1305 = vmatprep.subr.bf16.mxu1 %v1304_v8  ;;  %v1278_v17 = vpack.c.bf16 %v52_v15, %v51_v14  ;;  %v100_v19 = vld [vmem:[%s2503_s2 + $0x198] sm:$0xff]  ;;  %v83_v20 = vld [vmem:[%s2503_s2 + $0x110] sm:$0xff]  ;;  %v70_v24 = vld [vmem:[%s2503_s2 + $0xa8] sm:$0xff]  ;;  %1277 = vmatprep.subr.bf16.mxu0 %v1276_v16  ;;  %v1804_v13 = vsub.s32 %v319_v63, %v321_v0 }
  0x19   :  { %1307 = vmatpush3.bf16.msra.mxu1 %v1306_v12  ;;  %v1308_v21 = vpack.c.bf16 %v100_v19, %v99_v18  ;;  %v84_v22 = vld [vmem:[%s2503_s2 + $0x118] sm:$0xff]  ;;  %v1280_v26 = vpack.c.bf16 %v70_v24, %v69_v23  ;;  %v53_v27 = vld [vmem:[%s2503_s2 + $0x20] sm:$0xff]  ;;  %v54_v28 = vld [vmem:[%s2503_s2 + $0x28] sm:$0xff] }
  0x1a   :  { %v1310_v25 = vpack.c.bf16 %v84_v22, %v83_v20  ;;  %v101_v29 = vld [vmem:[%s2503_s2 + $0x1a0] sm:$0xff]  ;;  %v102_v30 = vld [vmem:[%s2503_s2 + $0x1a8] sm:$0xff]  ;;  %v1282_v33 = vpack.c.bf16 %v54_v28, %v53_v27  ;;  %v71_v35 = vld [vmem:[%s2503_s2 + $0xb0] sm:$0xff] }
  0x1b   :  { %1309 = vmatprep.subr.bf16.mxu1 %v1308_v21  ;;  %v85_v31 = vld [vmem:[%s2503_s2 + $0x120] sm:$0xff]  ;;  %v86_v32 = vld [vmem:[%s2503_s2 + $0x128] sm:$0xff]  ;;  %1279 = vmatpush3.bf16.msra.mxu0 %v1278_v17  ;;  %v1312_v34 = vpack.c.bf16 %v102_v30, %v101_v29  ;;  %v72_v36 = vld [vmem:[%s2503_s2 + $0xb8] sm:$0xff] }
  0x1c   :  { %v55_v37 = vld [vmem:[%s2503_s2 + $0x30] sm:$0xff]  ;;  %1281 = vmatprep.subr.bf16.mxu0 %v1280_v26  ;;  %v1314_v38 = vpack.c.bf16 %v86_v32, %v85_v31  ;;  %v1284_v39 = vpack.c.bf16 %v72_v36, %v71_v35  ;;  %v56_v40 = vld [vmem:[%s2503_s2 + $0x38] sm:$0xff]  ;;  %v73_v46 = vld [vmem:[%s2503_s2 + $0xc0] sm:$0xff] }
  0x1d   :  { %1311 = vmatpush3.bf16.msra.mxu1 %v1310_v25  ;;  %v103_v41 = vld [vmem:[%s2503_s2 + $0x1b0] sm:$0xff]  ;;  %v104_v42 = vld [vmem:[%s2503_s2 + $0x1b8] sm:$0xff]  ;;  %v74_v50 = vld [vmem:[%s2503_s2 + $0xc8] sm:$0xff]  ;;  %v1286_v51 = vpack.c.bf16 %v56_v40, %v55_v37 }
  0x1e   :  { %1313 = vmatprep.subr.bf16.mxu1 %v1312_v34  ;;  %v1316_v43 = vpack.c.bf16 %v104_v42, %v103_v41  ;;  %v87_v44 = vld [vmem:[%s2503_s2 + $0x130] sm:$0xff]  ;;  %v88_v45 = vld [vmem:[%s2503_s2 + $0x138] sm:$0xff]  ;;  %v105_v52 = vld [vmem:[%s2503_s2 + $0x1c0] sm:$0xff]  ;;  %v1288_v55 = vpack.c.bf16 %v74_v50, %v73_v46 }
  0x1f   :  { %1283 = vmatpush3.bf16.msra.mxu0 %v1282_v33  ;;  %v106_v53 = vld [vmem:[%s2503_s2 + $0x1c8] sm:$0xff]  ;;  %v1318_v54 = vpack.c.bf16 %v88_v45, %v87_v44  ;;  %v57_v56 = vld [vmem:[%s2503_s2 + $0x40] sm:$0xff]  ;;  %v75_v61 = vld [vmem:[%s2503_s2 + $0xd0] sm:$0xff] }
  0x20   :  { %1285 = vmatprep.subr.bf16.mxu0 %v1284_v39  ;;  %v58_v57 = vld [vmem:[%s2503_s2 + $0x48] sm:$0xff]  ;;  %v89_v58 = vld [vmem:[%s2503_s2 + $0x140] sm:$0xff]  ;;  %v1320_v59 = vpack.c.bf16 %v106_v53, %v105_v52  ;;  %v76_v62 = vld [vmem:[%s2503_s2 + $0xd8] sm:$0xff] }
  0x21   :  { %1315 = vmatpush3.bf16.msra.mxu1 %v1314_v38  ;;  %v90_v60 = vld [vmem:[%s2503_s2 + $0x148] sm:$0xff]  ;;  %v107_v1 = vld [vmem:[%s2503_s2 + $0x1d0] sm:$0xff]  ;;  %v108_v2 = vld [vmem:[%s2503_s2 + $0x1d8] sm:$0xff]  ;;  %v1290_v3 = vpack.c.bf16 %v58_v57, %v57_v56  ;;  %v1292_v5 = vpack.c.bf16 %v76_v62, %v75_v61 }
  0x22   :  { %1317 = vmatprep.subr.bf16.mxu1 %v1316_v43  ;;  %v1322_v4 = vpack.c.bf16 %v90_v60, %v89_v58  ;;  %v59_v6 = vld [vmem:[%s2503_s2 + $0x50] sm:$0xff]  ;;  %v60_v7 = vld [vmem:[%s2503_s2 + $0x58] sm:$0xff]  ;;  %v1324_v9 = vpack.c.bf16 %v108_v2, %v107_v1  ;;  %v77_v11 = vld [vmem:[%s2503_s2 + $0xe0] sm:$0xff] }
  0x23   :  { %1287 = vmatpush3.bf16.msra.mxu0 %v1286_v51  ;;  %v91_v8 = vld [vmem:[%s2503_s2 + $0x150] sm:$0xff]  ;;  %v92_v10 = vld [vmem:[%s2503_s2 + $0x158] sm:$0xff]  ;;  %v78_v12 = vld [vmem:[%s2503_s2 + $0xe8] sm:$0xff]  ;;  %v1294_v16 = vpack.c.bf16 %v60_v7, %v59_v6 }
  0x24   :  { %1289 = vmatprep.subr.bf16.mxu0 %v1288_v55  ;;  %v109_v14 = vld [vmem:[%s2503_s2 + $0x1e0] sm:$0xff]  ;;  %v110_v15 = vld [vmem:[%s2503_s2 + $0x1e8] sm:$0xff]  ;;  %v1326_v18 = vpack.c.bf16 %v92_v10, %v91_v8  ;;  %v1296_v19 = vpack.c.bf16 %v78_v12, %v77_v11  ;;  %v79_v25 = vld [vmem:[%s2503_s2 + $0xf0] sm:$0xff] }
  0x25   :  { %1319 = vmatpush3.bf16.msra.mxu1 %v1318_v54  ;;  %v61_v17 = vld [vmem:[%s2503_s2 + $0x60] sm:$0xff]  ;;  %v62_v20 = vld [vmem:[%s2503_s2 + $0x68] sm:$0xff]  ;;  %v1328_v23 = vpack.c.bf16 %v110_v15, %v109_v14  ;;  %v80_v26 = vld [vmem:[%s2503_s2 + $0xf8] sm:$0xff] }
  0x26   :  { %1321 = vmatprep.subr.bf16.mxu1 %v1320_v59  ;;  %v93_v21 = vld [vmem:[%s2503_s2 + $0x160] sm:$0xff]  ;;  %v94_v24 = vld [vmem:[%s2503_s2 + $0x168] sm:$0xff]  ;;  %v111_v29 = vld [vmem:[%s2503_s2 + $0x1f0] sm:$0xff]  ;;  %v1298_v31 = vpack.c.bf16 %v62_v20, %v61_v17  ;;  %v1300_v35 = vpack.c.bf16 %v80_v26, %v79_v25 }
  0x27   :  { %1291 = vmatpush3.bf16.msra.mxu0 %v1290_v3  ;;  %v45_v22 = vld [vmem:[%s2502_s1] sm:$0xff]  ;;  %v112_v30 = vld [vmem:[%s2503_s2 + $0x1f8] sm:$0xff]  ;;  %v1330_v34 = vpack.c.bf16 %v94_v24, %v93_v21  ;;  %v63_v36 = vld [vmem:[%s2503_s2 + $0x70] sm:$0xff] }
  0x28   :  { %1293 = vmatprep.subr.bf16.mxu0 %v1292_v5  ;;  %v323_v27 = vrot.slane %v45_v22, %v1804_v13  ;;  %v316_v28 = vcombine.high %v45_v22, %v45_v22  ;;  %v64_v37 = vld [vmem:[%s2503_s2 + $0x78] sm:$0xff]  ;;  %v95_v38 = vld [vmem:[%s2503_s2 + $0x170] sm:$0xff]  ;;  %v1332_v39 = vpack.c.bf16 %v112_v30, %v111_v29  ;;  %v129_v41 = vld [vmem:[%s2503_s2 + $0x280] sm:$0xff] }
  0x29   :  { %1323 = vmatpush3.bf16.msra.mxu1 %v1322_v4  ;;  %v96_v40 = vld [vmem:[%s2503_s2 + $0x178] sm:$0xff]  ;;  %v130_v42 = vld [vmem:[%s2503_s2 + $0x288] sm:$0xff]  ;;  %v161_v44 = vld [vmem:[%s2503_s2 + $0x380] sm:$0xff]  ;;  %v1302_v46 = vpack.c.bf16 %v64_v37, %v63_v36 }
  0x2a   :  { %1325 = vmatprep.subr.bf16.mxu1 %v1324_v9  ;;  %v331_v32 = vcombine.high %v323_v27, %v323_v27  ;;  %v330_v33 = vrot.slane %v316_v28, %v1804_v13  ;;  %v162_v45 = vld [vmem:[%s2503_s2 + $0x388] sm:$0xff]  ;;  %v1334_v47 = vpack.c.bf16 %v96_v40, %v95_v38  ;;  %v1336_v48 = vpack.c.bf16 %v130_v42, %v129_v41  ;;  %v113_v49 = vld [vmem:[%s2503_s2 + $0x200] sm:$0xff]  ;;  %v131_v54 = vld [vmem:[%s2503_s2 + $0x290] sm:$0xff] }
  0x2b   :  { %1295 = vmatpush3.bf16.msra.mxu0 %v1294_v16  ;;  %v114_v50 = vld [vmem:[%s2503_s2 + $0x208] sm:$0xff]  ;;  %v145_v51 = vld [vmem:[%s2503_s2 + $0x300] sm:$0xff]  ;;  %v1368_v52 = vpack.c.bf16 %v162_v45, %v161_v44  ;;  %v132_v55 = vld [vmem:[%s2503_s2 + $0x298] sm:$0xff] }
  0x2c   :  { %1297 = vmatprep.subr.bf16.mxu0 %v1296_v19  ;;  %464 = vmatprep.mubr.f32.mxu0 %v331_v32  ;;  %v332_v43 = vcombine.high %v330_v33, %v330_v33  ;;  %v146_v53 = vld [vmem:[%s2503_s2 + $0x308] sm:$0xff]  ;;  %v163_v56 = vld [vmem:[%s2503_s2 + $0x390] sm:$0xff]  ;;  %v164_v57 = vld [vmem:[%s2503_s2 + $0x398] sm:$0xff]  ;;  %v1338_v58 = vpack.c.bf16 %v114_v50, %v113_v49  ;;  %v1340_v60 = vpack.c.bf16 %v132_v55, %v131_v54 }
  0x2d   :  { %1327 = vmatpush3.bf16.msra.mxu1 %v1326_v18  ;;  %v1370_v59 = vpack.c.bf16 %v146_v53, %v145_v51  ;;  %v115_v61 = vld [vmem:[%s2503_s2 + $0x210] sm:$0xff]  ;;  %v116_v62 = vld [vmem:[%s2503_s2 + $0x218] sm:$0xff]  ;;  %v1372_v0 = vpack.c.bf16 %v164_v57, %v163_v56  ;;  %v133_v2 = vld [vmem:[%s2503_s2 + $0x2a0] sm:$0xff] }
  0x2e   :  { %1329 = vmatprep.subr.bf16.mxu1 %v1328_v23  ;;  %534 = vmatprep.mubr.f32.mxu1 %v332_v43  ;;  %v147_v63 = vld [vmem:[%s2503_s2 + $0x310] sm:$0xff]  ;;  %v148_v1 = vld [vmem:[%s2503_s2 + $0x318] sm:$0xff]  ;;  %v134_v3 = vld [vmem:[%s2503_s2 + $0x2a8] sm:$0xff]  ;;  %v1342_v6 = vpack.c.bf16 %v116_v62, %v115_v61 }
  0x2f   :  { %1299 = vmatpush3.bf16.msra.mxu0 %v1298_v31  ;;  %v165_v4 = vld [vmem:[%s2503_s2 + $0x3a0] sm:$0xff]  ;;  %v166_v5 = vld [vmem:[%s2503_s2 + $0x3a8] sm:$0xff]  ;;  %v1374_v7 = vpack.c.bf16 %v148_v1, %v147_v63  ;;  %v1344_v8 = vpack.c.bf16 %v134_v3, %v133_v2  ;;  %v135_v15 = vld [vmem:[%s2503_s2 + $0x2b0] sm:$0xff] }
  0x30   :  { %1301 = vmatprep.subr.bf16.mxu0 %v1300_v35  ;;  %v117_v9 = vld [vmem:[%s2503_s2 + $0x220] sm:$0xff]  ;;  %v118_v10 = vld [vmem:[%s2503_s2 + $0x228] sm:$0xff]  ;;  %v1376_v12 = vpack.c.bf16 %v166_v5, %v165_v4  ;;  %v136_v16 = vld [vmem:[%s2503_s2 + $0x2b8] sm:$0xff] }
  0x31   :  { %1331 = vmatpush3.bf16.msra.mxu1 %v1330_v34  ;;  %v149_v11 = vld [vmem:[%s2503_s2 + $0x320] sm:$0xff]  ;;  %v150_v14 = vld [vmem:[%s2503_s2 + $0x328] sm:$0xff]  ;;  %v167_v17 = vld [vmem:[%s2503_s2 + $0x3b0] sm:$0xff]  ;;  %v1346_v19 = vpack.c.bf16 %v118_v10, %v117_v9  ;;  %v1348_v21 = vpack.c.bf16 %v136_v16, %v135_v15 }
  0x32   :  { %1333 = vmatprep.subr.bf16.mxu1 %v1332_v39  ;;  %v168_v18 = vld [vmem:[%s2503_s2 + $0x3b8] sm:$0xff]  ;;  %v1378_v20 = vpack.c.bf16 %v150_v14, %v149_v11  ;;  %v119_v22 = vld [vmem:[%s2503_s2 + $0x230] sm:$0xff]  ;;  %v138_v28 = vld [vmem:[%s2503_s2 + $0x2c8] sm:$0xff] }
  0x33   :  { %1303 = vmatpush3.bf16.msra.mxu0 %v1302_v46  ;;  %v120_v23 = vld [vmem:[%s2503_s2 + $0x238] sm:$0xff]  ;;  %v151_v24 = vld [vmem:[%s2503_s2 + $0x330] sm:$0xff]  ;;  %v1380_v25 = vpack.c.bf16 %v168_v18, %v167_v17  ;;  %v169_v29 = vld [vmem:[%s2503_s2 + $0x3c0] sm:$0xff] }
  0x34   :  { %1337 = vmatprep.subr.bf16.mxu0 %v1336_v48  ;;  %v152_v26 = vld [vmem:[%s2503_s2 + $0x338] sm:$0xff]  ;;  %v170_v30 = vld [vmem:[%s2503_s2 + $0x3c8] sm:$0xff]  ;;  %v1350_v32 = vpack.c.bf16 %v120_v23, %v119_v22  ;;  %v121_v37 = vld [vmem:[%s2503_s2 + $0x240] sm:$0xff] }
  0x35   :  { %1335 = vmatpush3.bf16.msra.mxu1 %v1334_v47  ;;  %v46_v31 = vld [vmem:[%s2502_s1 + $0x8] sm:$0xff]  ;;  %v1382_v35 = vpack.c.bf16 %v152_v26, %v151_v24  ;;  %v153_v39 = vld [vmem:[%s2503_s2 + $0x340] sm:$0xff]  ;;  %v1384_v40 = vpack.c.bf16 %v170_v30, %v169_v29  ;;  %v139_v42 = vld [vmem:[%s2503_s2 + $0x2d0] sm:$0xff] }
  0x36   :  { %1369 = vmatprep.subr.bf16.mxu1 %v1368_v52  ;;  %465 = vmatmul.mubr.f32.vlgmr.msra.gmra.mrb[0].mxu0 %v323_v27  ;;  %v137_v27 = vld [vmem:[%s2503_s2 + $0x2c0] sm:$0xff]  ;;  %v333_v34 = vcombine.high %v46_v31, %v46_v31  ;;  %v122_v38 = vld [vmem:[%s2503_s2 + $0x248] sm:$0xff]  ;;  %v140_v43 = vld [vmem:[%s2503_s2 + $0x2d8] sm:$0xff] }
  0x37   :  { %1339 = vmatpush3.bf16.msra.mxu0 %v1338_v58  ;;  %v1352_v36 = vpack.c.bf16 %v138_v28, %v137_v27  ;;  %v154_v41 = vld [vmem:[%s2503_s2 + $0x348] sm:$0xff]  ;;  %v171_v46 = vld [vmem:[%s2503_s2 + $0x3d0] sm:$0xff]  ;;  %v172_v47 = vld [vmem:[%s2503_s2 + $0x3d8] sm:$0xff]  ;;  %v1354_v48 = vpack.c.bf16 %v122_v38, %v121_v37  ;;  %v1356_v51 = vpack.c.bf16 %v140_v43, %v139_v42 }
  0x38   :  { %535 = vmatmul.mubr.f32.vlgmr.msra.gmra.mrb[0].mxu1 %v330_v33  ;;  %1341 = vmatprep.subr.bf16.mxu0 %v1340_v60  ;;  %v1965_v33 = vrot.slane %v46_v31, %v1804_v13  ;;  %v1988_v45 = vrot.slane %v333_v34, %v1804_v13  ;;  %v1386_v50 = vpack.c.bf16 %v154_v41, %v153_v39  ;;  %v123_v52 = vld [vmem:[%s2503_s2 + $0x250] sm:$0xff]  ;;  %v124_v53 = vld [vmem:[%s2503_s2 + $0x258] sm:$0xff]  ;;  %v141_v57 = vld [vmem:[%s2503_s2 + $0x2e0] sm:$0xff] }
  0x39   :  { %1371 = vmatpush3.bf16.msra.mxu1 %v1370_v59  ;;  %v155_v54 = vld [vmem:[%s2503_s2 + $0x350] sm:$0xff]  ;;  %v1388_v55 = vpack.c.bf16 %v172_v47, %v171_v46  ;;  %v156_v56 = vld [vmem:[%s2503_s2 + $0x358] sm:$0xff]  ;;  %v142_v58 = vld [vmem:[%s2503_s2 + $0x2e8] sm:$0xff]  ;;  %v1358_v61 = vpack.c.bf16 %v124_v53, %v123_v52 }
  0x3a   :  { %1373 = vmatprep.subr.bf16.mxu1 %v1372_v0  ;;  %v348_v44 = vcombine.high %v1965_v33, %v1965_v33  ;;  %v349_v49 = vcombine.high %v1988_v45, %v1988_v45  ;;  %v173_v59 = vld [vmem:[%s2503_s2 + $0x3e0] sm:$0xff]  ;;  %v174_v60 = vld [vmem:[%s2503_s2 + $0x3e8] sm:$0xff]  ;;  %v1390_v62 = vpack.c.bf16 %v156_v56, %v155_v54  ;;  %v1360_v63 = vpack.c.bf16 %v142_v58, %v141_v57  ;;  %v143_v5 = vld [vmem:[%s2503_s2 + $0x2f0] sm:$0xff] }
  0x3b   :  { %1343 = vmatpush3.bf16.msra.mxu0 %v1342_v6  ;;  %v125_v0 = vld [vmem:[%s2503_s2 + $0x260] sm:$0xff]  ;;  %v126_v1 = vld [vmem:[%s2503_s2 + $0x268] sm:$0xff]  ;;  %v1392_v3 = vpack.c.bf16 %v174_v60, %v173_v59  ;;  %v144_v6 = vld [vmem:[%s2503_s2 + $0x2f8] sm:$0xff] }
  0x3c   :  { %1345 = vmatprep.subr.bf16.mxu0 %v1344_v8  ;;  %604 = vmatprep.mubr.f32.mxu0 %v348_v44  ;;  %v157_v2 = vld [vmem:[%s2503_s2 + $0x360] sm:$0xff]  ;;  %v158_v4 = vld [vmem:[%s2503_s2 + $0x368] sm:$0xff]  ;;  %v176_v8 = vld [vmem:[%s2503_s2 + $0x3f8] sm:$0xff]  ;;  %v1362_v9 = vpack.c.bf16 %v126_v1, %v125_v0  ;;  %v1364_v11 = vpack.c.bf16 %v144_v6, %v143_v5 }
  0x3d   :  { %1375 = vmatpush3.bf16.msra.mxu1 %v1374_v7  ;;  %674 = vmatprep.mubr.f32.mxu1 %v349_v49  ;;  %v175_v7 = vld [vmem:[%s2503_s2 + $0x3f0] sm:$0xff]  ;;  %v1394_v10 = vpack.c.bf16 %v158_v4, %v157_v2  ;;  %v128_v14 = vld [vmem:[%s2503_s2 + $0x278] sm:$0xff]  ;;  %v193_v18 = vld [vmem:[%s2503_s2 + $0x480] sm:$0xff] }
  0x3e   :  { %1377 = vmatprep.subr.bf16.mxu1 %v1376_v12  ;;  %v127_v12 = vld [vmem:[%s2503_s2 + $0x270] sm:$0xff]  ;;  %v1396_v16 = vpack.c.bf16 %v176_v8, %v175_v7  ;;  %v160_v17 = vld [vmem:[%s2503_s2 + $0x378] sm:$0xff]  ;;  %v177_v23 = vld [vmem:[%s2503_s2 + $0x400] sm:$0xff] }
  0x3f   :  { %1347 = vmatpush3.bf16.msra.mxu0 %v1346_v19  ;;  %v159_v15 = vld [vmem:[%s2503_s2 + $0x370] sm:$0xff]  ;;  %v194_v19 = vld [vmem:[%s2503_s2 + $0x488] sm:$0xff]  ;;  %v1366_v22 = vpack.c.bf16 %v128_v14, %v127_v12  ;;  %v209_v27 = vld [vmem:[%s2503_s2 + $0x500] sm:$0xff] }
  0x40   :  { %1349 = vmatprep.subr.bf16.mxu0 %v1348_v21  ;;  %v226_v21 = vld [vmem:[%s2503_s2 + $0x588] sm:$0xff]  ;;  %v1398_v24 = vpack.c.bf16 %v160_v17, %v159_v15  ;;  %v195_v30 = vld [vmem:[%s2503_s2 + $0x490] sm:$0xff]  ;;  %v196_v31 = vld [vmem:[%s2503_s2 + $0x498] sm:$0xff] }
  0x41   :  { %1379 = vmatpush3.bf16.msra.mxu1 %v1378_v20  ;;  %v225_v20 = vld [vmem:[%s2503_s2 + $0x580] sm:$0xff]  ;;  %v178_v26 = vld [vmem:[%s2503_s2 + $0x408] sm:$0xff]  ;;  %v228_v34 = vld [vmem:[%s2503_s2 + $0x598] sm:$0xff]  ;;  %v1404_v38 = vpack.c.bf16 %v196_v31, %v195_v30 }
  0x42   :  { %1381 = vmatprep.subr.bf16.mxu1 %v1380_v25  ;;  %v1400_v25 = vpack.c.bf16 %v194_v19, %v193_v18  ;;  %v210_v28 = vld [vmem:[%s2503_s2 + $0x508] sm:$0xff]  ;;  %v1432_v29 = vpack.c.bf16 %v226_v21, %v225_v20  ;;  %v47_v37 = vld [vmem:[%s2502_s1 + $0x10] sm:$0xff]  ;;  %v212_v46 = vld [vmem:[%s2503_s2 + $0x518] sm:$0xff] }
  0x43   :  { %1351 = vmatpush3.bf16.msra.mxu0 %v1350_v32  ;;  %v227_v32 = vld [vmem:[%s2503_s2 + $0x590] sm:$0xff]  ;;  %v2107_v42 = vrot.slane %v47_v37, %v1804_v13  ;;  %v350_v43 = vcombine.high %v47_v37, %v47_v37  ;;  %v197_v47 = vld [vmem:[%s2503_s2 + $0x4a0] sm:$0xff]  ;;  %v182_v56 = vld [vmem:[%s2503_s2 + $0x428] sm:$0xff] }
  0x44   :  { %1353 = vmatprep.subr.bf16.mxu0 %v1352_v36  ;;  %v1434_v36 = vpack.c.bf16 %v210_v28, %v209_v27  ;;  %v179_v39 = vld [vmem:[%s2503_s2 + $0x410] sm:$0xff]  ;;  %v1436_v44 = vpack.c.bf16 %v228_v34, %v227_v32  ;;  %v229_v49 = vld [vmem:[%s2503_s2 + $0x5a0] sm:$0xff]  ;;  %v214_v59 = vld [vmem:[%s2503_s2 + $0x528] sm:$0xff] }
  0x45   :  { %1383 = vmatpush3.bf16.msra.mxu1 %v1382_v35  ;;  %v1402_v35 = vpack.c.bf16 %v178_v26, %v177_v23  ;;  %v211_v41 = vld [vmem:[%s2503_s2 + $0x510] sm:$0xff]  ;;  %v2128_v52 = vrot.slane %v350_v43, %v1804_v13  ;;  %v213_v57 = vld [vmem:[%s2503_s2 + $0x520] sm:$0xff]  ;;  %v184_v4 = vld [vmem:[%s2503_s2 + $0x438] sm:$0xff] }
  0x46   :  { %1385 = vmatprep.subr.bf16.mxu1 %v1384_v40  ;;  %v180_v40 = vld [vmem:[%s2503_s2 + $0x418] sm:$0xff]  ;;  %v199_v60 = vld [vmem:[%s2503_s2 + $0x4b0] sm:$0xff]  ;;  %v1442_v1 = vpack.c.bf16 %v214_v59, %v213_v57  ;;  %v201_v8 = vld [vmem:[%s2503_s2 + $0x4c0] sm:$0xff] }
  0x47   :  { %1355 = vmatpush3.bf16.msra.mxu0 %v1354_v48  ;;  %v198_v48 = vld [vmem:[%s2503_s2 + $0x4a8] sm:$0xff]  ;;  %v1406_v53 = vpack.c.bf16 %v180_v40, %v179_v39  ;;  %v215_v5 = vld [vmem:[%s2503_s2 + $0x530] sm:$0xff]  ;;  %v216_v7 = vld [vmem:[%s2503_s2 + $0x538] sm:$0xff] }
  0x48   :  { %1357 = vmatprep.subr.bf16.mxu0 %v1356_v51  ;;  %v365_v51 = vcombine.high %v2107_v42, %v2107_v42  ;;  %v1408_v54 = vpack.c.bf16 %v198_v48, %v197_v47  ;;  %v1446_v14 = vpack.c.bf16 %v216_v7, %v215_v5  ;;  %v186_v17 = vld [vmem:[%s2503_s2 + $0x448] sm:$0xff]  ;;  %v217_v18 = vld [vmem:[%s2503_s2 + $0x540] sm:$0xff]  ;;  %v203_v21 = vld [vmem:[%s2503_s2 + $0x4d0] sm:$0xff] }
  0x49   :  { %1387 = vmatpush3.bf16.msra.mxu1 %v1386_v50  ;;  %v230_v50 = vld [vmem:[%s2503_s2 + $0x5a8] sm:$0xff]  ;;  %v235_v23 = vld [vmem:[%s2503_s2 + $0x5d0] sm:$0xff]  ;;  %v220_v32 = vld [vmem:[%s2503_s2 + $0x558] sm:$0xff] }
  0x4a   :  { %1389 = vmatprep.subr.bf16.mxu1 %v1388_v55  ;;  %v181_v55 = vld [vmem:[%s2503_s2 + $0x420] sm:$0xff]  ;;  %v1440_v58 = vpack.c.bf16 %v230_v50, %v229_v49  ;;  %v218_v20 = vld [vmem:[%s2503_s2 + $0x548] sm:$0xff]  ;;  %v187_v28 = vld [vmem:[%s2503_s2 + $0x450] sm:$0xff] }
  0x4b   :  { %1359 = vmatpush3.bf16.msra.mxu0 %v1358_v61  ;;  %v200_v61 = vld [vmem:[%s2503_s2 + $0x4b8] sm:$0xff]  ;;  %v1410_v0 = vpack.c.bf16 %v182_v56, %v181_v55  ;;  %v1450_v26 = vpack.c.bf16 %v218_v20, %v217_v18  ;;  %v219_v30 = vld [vmem:[%s2503_s2 + $0x550] sm:$0xff]  ;;  %v205_v34 = vld [vmem:[%s2503_s2 + $0x4e0] sm:$0xff] }
  0x4c   :  { %1361 = vmatprep.subr.bf16.mxu0 %v1360_v63  ;;  %v232_v63 = vld [vmem:[%s2503_s2 + $0x5b8] sm:$0xff]  ;;  %v1412_v2 = vpack.c.bf16 %v200_v61, %v199_v60  ;;  %v238_v37 = vld [vmem:[%s2503_s2 + $0x5e8] sm:$0xff]  ;;  %v1454_v39 = vpack.c.bf16 %v220_v32, %v219_v30  ;;  %v207_v48 = vld [vmem:[%s2503_s2 + $0x4f0] sm:$0xff] }
  0x4d   :  { %1391 = vmatpush3.bf16.msra.mxu1 %v1390_v62  ;;  %v231_v62 = vld [vmem:[%s2503_s2 + $0x5b0] sm:$0xff]  ;;  %v190_v43 = vld [vmem:[%s2503_s2 + $0x468] sm:$0xff]  ;;  %v208_v49 = vld [vmem:[%s2503_s2 + $0x4f8] sm:$0xff] }
  0x4e   :  { %1393 = vmatprep.subr.bf16.mxu1 %v1392_v3  ;;  %v183_v3 = vld [vmem:[%s2503_s2 + $0x430] sm:$0xff]  ;;  %v1444_v6 = vpack.c.bf16 %v232_v63, %v231_v62  ;;  %v222_v47 = vld [vmem:[%s2503_s2 + $0x568] sm:$0xff]  ;;  %v1428_v55 = vpack.c.bf16 %v208_v49, %v207_v48  ;;  %v192_v57 = vld [vmem:[%s2503_s2 + $0x478] sm:$0xff] }
  0x4f   :  { %1363 = vmatpush3.bf16.msra.mxu0 %v1362_v9  ;;  %v202_v9 = vld [vmem:[%s2503_s2 + $0x4c8] sm:$0xff]  ;;  %v1414_v12 = vpack.c.bf16 %v184_v4, %v183_v3  ;;  %v239_v50 = vld [vmem:[%s2503_s2 + $0x5f0] sm:$0xff]  ;;  %v224_v59 = vld [vmem:[%s2503_s2 + $0x578] sm:$0xff] }
  0x50   :  { %1365 = vmatprep.subr.bf16.mxu0 %v1364_v11  ;;  %v234_v11 = vld [vmem:[%s2503_s2 + $0x5c8] sm:$0xff]  ;;  %v1416_v15 = vpack.c.bf16 %v202_v9, %v201_v8  ;;  %v191_v56 = vld [vmem:[%s2503_s2 + $0x470] sm:$0xff]  ;;  %v257_v60 = vld [vmem:[%s2503_s2 + $0x680] sm:$0xff] }
  0x51   :  { %1395 = vmatpush3.bf16.msra.mxu1 %v1394_v10  ;;  %v233_v10 = vld [vmem:[%s2503_s2 + $0x5c0] sm:$0xff]  ;;  %v258_v61 = vld [vmem:[%s2503_s2 + $0x688] sm:$0xff]  ;;  %v259_v9 = vld [vmem:[%s2503_s2 + $0x690] sm:$0xff] }
  0x52   :  { %1397 = vmatprep.subr.bf16.mxu1 %v1396_v16  ;;  %v185_v16 = vld [vmem:[%s2503_s2 + $0x440] sm:$0xff]  ;;  %v1448_v19 = vpack.c.bf16 %v234_v11, %v233_v10  ;;  %v290_v63 = vld [vmem:[%s2503_s2 + $0x788] sm:$0xff]  ;;  %v1464_v3 = vpack.c.bf16 %v258_v61, %v257_v60  ;;  %v260_v10 = vld [vmem:[%s2503_s2 + $0x698] sm:$0xff] }
  0x53   :  { %1367 = vmatpush3.bf16.msra.mxu0 %v1366_v22  ;;  %v204_v22 = vld [vmem:[%s2503_s2 + $0x4d8] sm:$0xff]  ;;  %v289_v62 = vld [vmem:[%s2503_s2 + $0x780] sm:$0xff]  ;;  %v242_v5 = vld [vmem:[%s2503_s2 + $0x608] sm:$0xff]  ;;  %v1468_v18 = vpack.c.bf16 %v260_v10, %v259_v9 }
  0x54   :  { %1401 = vmatprep.subr.bf16.mxu0 %v1400_v25  ;;  %v1418_v25 = vpack.c.bf16 %v186_v17, %v185_v16  ;;  %v1420_v27 = vpack.c.bf16 %v204_v22, %v203_v21  ;;  %v241_v4 = vld [vmem:[%s2503_s2 + $0x600] sm:$0xff]  ;;  %v1496_v7 = vpack.c.bf16 %v290_v63, %v289_v62  ;;  %v274_v8 = vld [vmem:[%s2503_s2 + $0x708] sm:$0xff]  ;;  %v244_v20 = vld [vmem:[%s2503_s2 + $0x618] sm:$0xff] }
  0x55   :  { %1399 = vmatpush3.bf16.msra.mxu1 %v1398_v24  ;;  %v236_v24 = vld [vmem:[%s2503_s2 + $0x5d8] sm:$0xff]  ;;  %v1466_v16 = vpack.c.bf16 %v242_v5, %v241_v4  ;;  %v275_v21 = vld [vmem:[%s2503_s2 + $0x710] sm:$0xff]  ;;  %v246_v32 = vld [vmem:[%s2503_s2 + $0x628] sm:$0xff] }
  0x56   :  { %1433 = vmatprep.subr.bf16.mxu1 %v1432_v29  ;;  %605 = vmatmul.mubr.f32.vlgmr.msra.gmra.mrb[2].mxu0 %v1965_v33  ;;  %v1438_v33 = vpack.c.bf16 %v212_v46, %v211_v41  ;;  %v188_v29 = vld [vmem:[%s2503_s2 + $0x458] sm:$0xff]  ;;  %v1452_v31 = vpack.c.bf16 %v236_v24, %v235_v23  ;;  %v189_v41 = vld [vmem:[%s2503_s2 + $0x460] sm:$0xff]  ;;  %v262_v24 = vld [vmem:[%s2503_s2 + $0x6a8] sm:$0xff] }
  0x57   :  { %1403 = vmatpush3.bf16.msra.mxu0 %v1402_v35  ;;  %744 = vmatprep.mubr.f32.mxu0 %v365_v51  ;;  %v206_v35 = vld [vmem:[%s2503_s2 + $0x4e8] sm:$0xff]  ;;  %v240_v51 = vld [vmem:[%s2503_s2 + $0x5f8] sm:$0xff]  ;;  %v261_v23 = vld [vmem:[%s2503_s2 + $0x6a0] sm:$0xff] }
  0x58   :  { %675 = vmatmul.mubr.f32.vlgmr.msra.gmra.mrb[2].mxu1 %v1988_v45  ;;  %1405 = vmatprep.subr.bf16.mxu0 %v1404_v38  ;;  %v366_v45 = vcombine.high %v2128_v52, %v2128_v52  ;;  %v1422_v38 = vpack.c.bf16 %v188_v29, %v187_v28  ;;  %v1424_v40 = vpack.c.bf16 %v206_v35, %v205_v34  ;;  %v276_v22 = vld [vmem:[%s2503_s2 + $0x718] sm:$0xff]  ;;  %v277_v34 = vld [vmem:[%s2503_s2 + $0x720] sm:$0xff]  ;;  %v282_v60 = vld [vmem:[%s2503_s2 + $0x748] sm:$0xff] }
  0x59   :  { %1435 = vmatpush3.bf16.msra.mxu1 %v1434_v36  ;;  %v237_v36 = vld [vmem:[%s2503_s2 + $0x5e0] sm:$0xff]  ;;  %v1502_v30 = vpack.c.bf16 %v276_v22, %v275_v21  ;;  %v280_v49 = vld [vmem:[%s2503_s2 + $0x738] sm:$0xff]  ;;  %v267_v61 = vld [vmem:[%s2503_s2 + $0x6d0] sm:$0xff] }
  0x5a   :  { %1437 = vmatprep.subr.bf16.mxu1 %v1436_v44  ;;  %814 = vmatprep.mubr.f32.mxu1 %v366_v45  ;;  %v221_v44 = vld [vmem:[%s2503_s2 + $0x560] sm:$0xff]  ;;  %v1456_v46 = vpack.c.bf16 %v238_v37, %v237_v36  ;;  %v223_v45 = vld [vmem:[%s2503_s2 + $0x570] sm:$0xff]  ;;  %v264_v37 = vld [vmem:[%s2503_s2 + $0x6b8] sm:$0xff] }
  0x5b   :  { %1407 = vmatpush3.bf16.msra.mxu0 %v1406_v53  ;;  %v1426_v53 = vpack.c.bf16 %v190_v43, %v189_v41  ;;  %v263_v36 = vld [vmem:[%s2503_s2 + $0x6b0] sm:$0xff]  ;;  %v268_v62 = vld [vmem:[%s2503_s2 + $0x6d8] sm:$0xff]  ;;  %v269_v9 = vld [vmem:[%s2503_s2 + $0x6e0] sm:$0xff] }
  0x5c   :  { %1409 = vmatprep.subr.bf16.mxu0 %v1408_v54  ;;  %v1458_v54 = vpack.c.bf16 %v222_v47, %v221_v44  ;;  %v1476_v43 = vpack.c.bf16 %v264_v37, %v263_v36  ;;  %v247_v44 = vld [vmem:[%s2503_s2 + $0x630] sm:$0xff]  ;;  %v252_v5 = vld [vmem:[%s2503_s2 + $0x658] sm:$0xff]  ;;  %v270_v10 = vld [vmem:[%s2503_s2 + $0x6e8] sm:$0xff] }
  0x5d   :  { %1439 = vmatpush3.bf16.msra.mxu1 %v1438_v33  ;;  %v48_v33 = vld [vmem:[%s2502_s1 + $0x18] sm:$0xff]  ;;  %v279_v47 = vld [vmem:[%s2503_s2 + $0x730] sm:$0xff]  ;;  %v285_v21 = vld [vmem:[%s2503_s2 + $0x760] sm:$0xff] }
  0x5e   :  { %1441 = vmatprep.subr.bf16.mxu1 %v1440_v58  ;;  %v1460_v58 = vpack.c.bf16 %v240_v51, %v239_v50  ;;  %v2299_v11 = vrot.slane %v48_v33, %v1804_v13  ;;  %v265_v50 = vld [vmem:[%s2503_s2 + $0x6c0] sm:$0xff]  ;;  %v266_v51 = vld [vmem:[%s2503_s2 + $0x6c8] sm:$0xff]  ;;  %v299_v63 = vld [vmem:[%s2503_s2 + $0x7d0] sm:$0xff] }
  0x5f   :  { %1411 = vmatpush3.bf16.msra.mxu0 %v1410_v0  ;;  %v367_v0 = vcombine.high %v48_v33, %v48_v33  ;;  %v298_v33 = vld [vmem:[%s2503_s2 + $0x7c8] sm:$0xff]  ;;  %v251_v4 = vld [vmem:[%s2503_s2 + $0x650] sm:$0xff]  ;;  %v33_v36 = vld [vmem:[#allocation2] sm:$0xff] }
  0x60   :  { %1413 = vmatprep.subr.bf16.mxu0 %v1412_v2  ;;  %v1462_v2 = vpack.c.bf16 %v224_v59, %v223_v45  ;;  %v250_v45 = vld [vmem:[%s2503_s2 + $0x648] sm:$0xff]  ;;  %39 = vst [vmem:[#allocation5] sm:$0xff] %v33_v36 }
  0x61   :  { %1443 = vmatpush3.bf16.msra.mxu1 %v1442_v1  ;;  %v1430_v1 = vpack.c.bf16 %v192_v57, %v191_v56  ;;  %v1480_v56 = vpack.c.bf16 %v266_v51, %v265_v50  ;;  %v249_v57 = vld [vmem:[%s2503_s2 + $0x640] sm:$0xff]  ;;  %v286_v22 = vld [vmem:[%s2503_s2 + $0x768] sm:$0xff] }
  0x62   :  { %1445 = vmatprep.subr.bf16.mxu1 %v1444_v6  ;;  %v273_v6 = vld [vmem:[%s2503_s2 + $0x700] sm:$0xff]  ;;  %v34_v37 = vld [vmem:[#allocation2 + $0x8] sm:$0xff] }
  0x63   :  { %1415 = vmatpush3.bf16.msra.mxu0 %v1414_v12  ;;  %v291_v12 = vld [vmem:[%s2503_s2 + $0x790] sm:$0xff]  ;;  %v1498_v17 = vpack.c.bf16 %v274_v8, %v273_v6  ;;  %v284_v8 = vld [vmem:[%s2503_s2 + $0x758] sm:$0xff]  ;;  %40 = vst [vmem:[#allocation5 + $0x8] sm:$0xff] %v34_v37 }
  0x64   :  { %1417 = vmatprep.subr.bf16.mxu0 %v1416_v15  ;;  %v2308_v15 = vrot.slane %v367_v0, %v1804_v13  ;;  %v300_v0 = vld [vmem:[%s2503_s2 + $0x7d8] sm:$0xff]  ;;  %v283_v6 = vld [vmem:[%s2503_s2 + $0x750] sm:$0xff] }
  0x65   :  { %1447 = vmatpush3.bf16.msra.mxu1 %v1446_v14  ;;  %v292_v14 = vld [vmem:[%s2503_s2 + $0x798] sm:$0xff] }
  0x66   :  { %1449 = vmatprep.subr.bf16.mxu1 %v1448_v19  ;;  %v243_v19 = vld [vmem:[%s2503_s2 + $0x610] sm:$0xff]  ;;  %v1500_v13 = vpack.c.bf16 %v292_v14, %v291_v12  ;;  %v383_v28 = vcombine.high %v2308_v15, %v2308_v15  ;;  %v301_v12 = vld [vmem:[%s2503_s2 + $0x7e0] sm:$0xff]  ;;  %v302_v14 = vld [vmem:[%s2503_s2 + $0x7e8] sm:$0xff] }
  0x67   :  { %1419 = vmatpush3.bf16.msra.mxu0 %v1418_v25  ;;  %v382_v25 = vcombine.high %v2299_v11, %v2299_v11  ;;  %v1470_v29 = vpack.c.bf16 %v244_v20, %v243_v19  ;;  %v253_v19 = vld [vmem:[%s2503_s2 + $0x660] sm:$0xff]  ;;  %v254_v20 = vld [vmem:[%s2503_s2 + $0x668] sm:$0xff] }
  0x68   :  { %1421 = vmatprep.subr.bf16.mxu0 %v1420_v27  ;;  %v294_v27 = vld [vmem:[%s2503_s2 + $0x7a8] sm:$0xff] }
  0x69   :  { %1451 = vmatpush3.bf16.msra.mxu1 %v1450_v26  ;;  %v293_v26 = vld [vmem:[%s2503_s2 + $0x7a0] sm:$0xff] }
  0x6a   :  { %1453 = vmatprep.subr.bf16.mxu1 %v1452_v31  ;;  %v1472_v31 = vpack.c.bf16 %v262_v24, %v261_v23  ;;  %v1504_v35 = vpack.c.bf16 %v294_v27, %v293_v26  ;;  %v271_v23 = vld [vmem:[%s2503_s2 + $0x6f0] sm:$0xff]  ;;  %v272_v24 = vld [vmem:[%s2503_s2 + $0x6f8] sm:$0xff]  ;;  %v1490_v27 = vpack.c.bf16 %v254_v20, %v253_v19 }
  0x6b   :  { %1423 = vmatpush3.bf16.msra.mxu0 %v1422_v38  ;;  %v295_v38 = vld [vmem:[%s2503_s2 + $0x7b0] sm:$0xff]  ;;  %v304_v26 = vld [vmem:[%s2503_s2 + $0x7f8] sm:$0xff] }
  0x6c   :  { %1425 = vmatprep.subr.bf16.mxu0 %v1424_v40 }
  0x6d   :  { %1455 = vmatpush3.bf16.msra.mxu1 %v1454_v39  ;;  %v296_v39 = vld [vmem:[%s2503_s2 + $0x7b8] sm:$0xff] }
  0x6e   :  { %1457 = vmatprep.subr.bf16.mxu1 %v1456_v46  ;;  %v248_v46 = vld [vmem:[%s2503_s2 + $0x638] sm:$0xff]  ;;  %v1508_v48 = vpack.c.bf16 %v296_v39, %v295_v38  ;;  %v35_v38 = vld [vmem:[#allocation2 + $0x10] sm:$0xff] }
  0x6f   :  { %1427 = vmatpush3.bf16.msra.mxu0 %v1426_v53  ;;  %v297_v53 = vld [vmem:[%s2503_s2 + $0x7c0] sm:$0xff]  ;;  %v36_v39 = vld [vmem:[#allocation2 + $0x18] sm:$0xff]  ;;  %41 = vst [vmem:[#allocation5 + $0x10] sm:$0xff] %v35_v38 }
  0x70   :  { %1429 = vmatprep.subr.bf16.mxu0 %v1428_v55  ;;  %v1510_v55 = vpack.c.bf16 %v280_v49, %v279_v47  ;;  %v1512_v59 = vpack.c.bf16 %v298_v33, %v297_v53  ;;  %42 = vst [vmem:[#allocation5 + $0x18] sm:$0xff] %v36_v39 }
  0x71   :  { %1459 = vmatpush3.bf16.msra.mxu1 %v1458_v54  ;;  %v1478_v54 = vpack.c.bf16 %v248_v46, %v247_v44 }
  0x72   :  { %1461 = vmatprep.subr.bf16.mxu1 %v1460_v58  ;;  %v281_v58 = vld [vmem:[%s2503_s2 + $0x740] sm:$0xff] }
  0x73   :  { %1431 = vmatpush3.bf16.msra.mxu0 %v1430_v1  ;;  %v1482_v1 = vpack.c.bf16 %v250_v45, %v249_v57 }
  0x74   :  { %1465 = vmatprep.subr.bf16.mxu0 %v1464_v3  ;;  %v1484_v3 = vpack.c.bf16 %v268_v62, %v267_v61 }
  0x75   :  { %1463 = vmatpush3.bf16.msra.mxu1 %v1462_v2  ;;  %v1514_v2 = vpack.c.bf16 %v282_v60, %v281_v58 }
  0x76   :  { %1497 = vmatprep.subr.bf16.mxu1 %v1496_v7  ;;  %745 = vmatmul.mubr.f32.vlgmr.msra.gmra.mrb[4].mxu0 %v2107_v42  ;;  %v245_v42 = vld [vmem:[%s2503_s2 + $0x620] sm:$0xff]  ;;  %v1516_v7 = vpack.c.bf16 %v300_v0, %v299_v63 }
  0x77   :  { %1467 = vmatpush3.bf16.msra.mxu0 %v1466_v16  ;;  %884 = vmatprep.mubr.f32.mxu0 %v382_v25  ;;  %v1474_v40 = vpack.c.bf16 %v246_v32, %v245_v42  ;;  %v1486_v16 = vpack.c.bf16 %v252_v5, %v251_v4  ;;  %v303_v25 = vld [vmem:[%s2503_s2 + $0x7f0] sm:$0xff] }
  0x78   :  { %815 = vmatmul.mubr.f32.vlgmr.msra.gmra.mrb[4].mxu1 %v2128_v52  ;;  %1469 = vmatprep.subr.bf16.mxu0 %v1468_v18  ;;  %v278_v52 = vld [vmem:[%s2503_s2 + $0x728] sm:$0xff]  ;;  %v1488_v18 = vpack.c.bf16 %v270_v10, %v269_v9  ;;  %v1524_v42 = vpack.c.bf16 %v304_v26, %v303_v25  ;;  %v287_v32 = vld [vmem:[%s2503_s2 + $0x770] sm:$0xff] }
  0x79   :  { %1499 = vmatpush3.bf16.msra.mxu1 %v1498_v17  ;;  %954 = vmatprep.mubr.f32.mxu1 %v383_v28  ;;  %v1506_v41 = vpack.c.bf16 %v278_v52, %v277_v34  ;;  %v1518_v17 = vpack.c.bf16 %v284_v8, %v283_v6  ;;  %v1522_v28 = vpack.c.bf16 %v286_v22, %v285_v21  ;;  %v288_v34 = vld [vmem:[%s2503_s2 + $0x778] sm:$0xff] }
  0x7a   :  { %1501 = vmatprep.subr.bf16.mxu1 %v1500_v13  ;;  %v1520_v13 = vpack.c.bf16 %v302_v14, %v301_v12  ;;  %v1526_v52 = vpack.c.bf16 %v288_v34, %v287_v32 }
  0x7b   :  { %1471 = vmatpush3.bf16.msra.mxu0 %v1470_v29  ;;  %v1492_v29 = vpack.c.bf16 %v272_v24, %v271_v23 }
  0x7c   :  { %1473 = vmatprep.subr.bf16.mxu0 %v1472_v31  ;;  %v256_v31 = vld [vmem:[%s2503_s2 + $0x678] sm:$0xff] }
  0x7d   :  { %1503 = vmatpush3.bf16.msra.mxu1 %v1502_v30  ;;  %v255_v30 = vld [vmem:[%s2503_s2 + $0x670] sm:$0xff]  ;;  %s1610_s2 = smov [#allocation5]  }
  0x7e   :  { %1505 = vmatprep.subr.bf16.mxu1 %v1504_v35  ;;  %v1494_v35 = vpack.c.bf16 %v256_v31, %v255_v30  ;;  %s968_s25 = sshll.u32 %s1610_s2, 4  ;;  %s969_s25 = int_to_ptr.vmem [resolvable:$true] %s968_s25 }
  0x7f   :  { %1475 = vmatpush3.bf16.msra.mxu0 %v1474_v40  ;;  %v37_v40 = vld [vmem:[#allocation2 + $0x20] sm:$0xff]  ;;  %s1558_s26 = scalar_lea.vmem %s969_s25, 768  ;;  %p1563_p9 = scmp.lt.s32.totalorder %s969_s25, %s969_s25 }
  0x80   :  { %1477 = vmatprep.subr.bf16.mxu0 %v1476_v43  ;;  %43 = vst [vmem:[#allocation5 + $0x20] sm:$0xff] %v37_v40  ;;  %p1559_p8 = scmp.ne.s32.totalorder %s969_s25, %s1558_s26  ;;  %p1564_p10 = scmp.lt.s32.totalorder %s1558_s26, %s1558_s26 }
  0x81   :  { %1507 = vmatpush3.bf16.msra.mxu1 %v1506_v41  ;;  %v38_v41 = vld [vmem:[#allocation2 + $0x28] sm:$0xff] }
  0x82   :  { %1509 = vmatprep.subr.bf16.mxu1 %v1508_v48  ;;  %44 = vst [vmem:[#allocation5 + $0x28] sm:$0xff] %v38_v41  ;;  %p1565_p11 = por %p1564_p10, %p1563_p9 }
  0x83   :  { %1479 = vmatpush3.bf16.msra.mxu0 %v1478_v54 }
  0x84   :  { %1481 = vmatprep.subr.bf16.mxu0 %v1480_v56  ;;  %p1566_p12 = pnand %p1565_p11, %p1559_p8 }
  0x85   :  { %1511 = vmatpush3.bf16.msra.mxu1 %v1510_v55 }
  0x86   :  { %1513 = vmatprep.subr.bf16.mxu1 %v1512_v59 }
  0x87   :  { %1483 = vmatpush3.bf16.msra.mxu0 %v1482_v1 }
  0x88   :  { %1485 = vmatprep.subr.bf16.mxu0 %v1484_v3 }
  0x89   :  { %1515 = vmatpush3.bf16.msra.mxu1 %v1514_v2 }
  0x8a   :  { %1517 = vmatprep.subr.bf16.mxu1 %v1516_v7 }
  0x8b   :  { %1487 = vmatpush3.bf16.msra.mxu0 %v1486_v16 }
  0x8c   :  { %1489 = vmatprep.subr.bf16.mxu0 %v1488_v18 }
  0x8d   :  { %1519 = vmatpush3.bf16.msra.mxu1 %v1518_v17 }
  0x8e   :  { %1521 = vmatprep.subr.bf16.mxu1 %v1520_v13 }
  0x8f   :  { %1491 = vmatpush3.bf16.msra.mxu0 %v1490_v27 }
  0x90   :  { %1493 = vmatprep.subr.bf16.mxu0 %v1492_v29 }
  0x91   :  { %1523 = vmatpush3.bf16.msra.mxu1 %v1522_v28 }
  0x92   :  { %1525 = vmatprep.subr.bf16.mxu1 %v1524_v42 }
  0x93   :  { %1495 = vmatpush3.bf16.msra.mxu0 %v1494_v35 }
  0x95   :  { %1527 = vmatpush3.bf16.msra.mxu1 %v1526_v52 }
  0x96   :  { %885 = vmatmul.mubr.f32.vlgmr.msra.gmra.mrb[6].mxu0 %v2299_v11 }
  0x98   :  { %955 = vmatmul.mubr.f32.vlgmr.msra.gmra.mrb[6].mxu1 %v2308_v15 }
  0x99   :  { %1569 = shalt.err (!%p1566_p12)
}
  0x9a   :  { %s1570_s29 = scalar_lea.hbm %s2505_s4, 768 }
  0x9b   :  { %p1571_p13 = scmp.ne.s32.totalorder %s2505_s4, %s1570_s29  ;;  %p1574_p0 = scmp.lt.u32.totalorder %s1570_s29, %s2505_s4 }
  0x9d   :  { %p1576_p1 = pnand %p1574_p0, %p1571_p13 }
  0x9f   :  { %1579 = shalt.err (!%p1576_p1)
}
  0xa0   :  { %971 = dma.vmem_to_hbm [thread:$0]  %s969_s25, 768, %s2505_s4, [#allocation4]   ;;  %v991_v15 = vld [vmem:[%s2504_s3] ss:$0 sm:$0xff]  ;;  %vm960_vm0 = vcmask 58368  }
  0xa1   :  { %s1611_s3 = smov [#allocation6]  }
  0xa2   :  { %s978_s4 = sshll.u32 %s1611_s3, 4  ;;  %s979_s4 = int_to_ptr.vmem [resolvable:$true] %s978_s4 }
  0xa3   :  { %s1580_s12 = scalar_lea.vmem %s979_s4, 32  ;;  %p1585_p3 = scmp.lt.s32.totalorder %s979_s4, %s979_s4 }
  0xa4   :  { %p1581_p2 = scmp.ne.s32.totalorder %s979_s4, %s1580_s12  ;;  %p1586_p4 = scmp.lt.s32.totalorder %s1580_s12, %s1580_s12 }
  0xa6   :  { %p1587_p5 = por %p1586_p4, %p1585_p3 }
  0xa8   :  { %p1588_p6 = pnand %p1587_p5, %p1581_p2 }
 0x109   :  { %v1024_v11 = vpop.f32.mrb[0].mxu0 }
 0x10a   :  { %v1025_v43 = vpop.f32.mrb[1].mxu0 }
 0x10b   :  { %v1059_v44 = vpop.f32.mrb[0].mxu1  ;;  %v1026_v46 = vadd.f32 %v1025_v43, %v1024_v11 }
 0x10c   :  { %v1060_v47 = vpop.f32.mrb[1].mxu1 }
 0x10d   :  { %v1061_v48 = vadd.f32 %v1060_v47, %v1059_v44  ;;  %v467_v49 = vadd.f32 %v1026_v46, %v991_v15 }
 0x10f   :  { %v537_v50 = vadd.f32 %v1061_v48, %v467_v49 }
 0x129   :  { %v1094_v51 = vpop.f32.mrb[2].mxu0 }
 0x12a   :  { %v1095_v53 = vpop.f32.mrb[3].mxu0 }
 0x12b   :  { %v1129_v33 = vpop.f32.mrb[2].mxu1  ;;  %v1096_v54 = vadd.f32 %v1095_v53, %v1094_v51 }
 0x12c   :  { %v1130_v55 = vpop.f32.mrb[3].mxu1 }
 0x12d   :  { %v1131_v56 = vadd.f32 %v1130_v55, %v1129_v33  ;;  %v607_v57 = vadd.f32 %v1096_v54, %v537_v50 }
 0x12f   :  { %v677_v45 = vadd.f32 %v1131_v56, %v607_v57 }
 0x149   :  { %v1164_v58 = vpop.f32.mrb[4].mxu0 }
 0x14a   :  { %v1165_v59 = vpop.f32.mrb[5].mxu0 }
 0x14b   :  { %v1199_v60 = vpop.f32.mrb[4].mxu1  ;;  %v1166_v61 = vadd.f32 %v1165_v59, %v1164_v58 }
 0x14c   :  { %v1200_v62 = vpop.f32.mrb[5].mxu1 }
 0x14d   :  { %v1201_v63 = vadd.f32 %v1200_v62, %v1199_v60  ;;  %v747_v0 = vadd.f32 %v1166_v61, %v677_v45 }
 0x14f   :  { %v817_v1 = vadd.f32 %v1201_v63, %v747_v0 }
 0x169   :  { %v1234_v2 = vpop.f32.mrb[6].mxu0 }
 0x16a   :  { %v1235_v3 = vpop.f32.mrb[7].mxu0 }
 0x16b   :  { %v1269_v4 = vpop.f32.mrb[6].mxu1  ;;  %v1236_v5 = vadd.f32 %v1235_v3, %v1234_v2 }
 0x16c   :  { %v1270_v6 = vpop.f32.mrb[7].mxu1 }
 0x16d   :  { %v1271_v7 = vadd.f32 %v1270_v6, %v1269_v4  ;;  %v887_v8 = vadd.f32 %v1236_v5, %v817_v1 }
 0x16f   :  { %v957_v9 = vadd.f32 %v1271_v7, %v887_v8 }
 0x171   :  { %961 = vst.msk [vmem:[#allocation6] sm:$0x3] %vm960_vm0, %v957_v9 }
 0x172   :  { %1591 = shalt.err (!%p1588_p6)
}
 0x173   :  { %s1592_s14 = scalar_lea.hbm %s2506_s5, 32 }
 0x174   :  { %p1593_p7 = scmp.ne.s32.totalorder %s2506_s5, %s1592_s14  ;;  %p1596_p8 = scmp.lt.u32.totalorder %s1592_s14, %s2506_s5 }
 0x176   :  { %p1598_p9 = pnand %p1596_p8, %p1593_p7 }
 0x178   :  { %1601 = shalt.err (!%p1598_p9)
}
 0x179   :  { %981 = dma.vmem_to_hbm [thread:$0]  %s979_s4, 32, %s2506_s5, [#allocation7]  }
 0x17a   :  { %1604 = dma.done.wait [#allocation4], 768  }
 0x17b   :  { %1605 = vsyncadd [#allocation4], 4294966528 }
 0x17c   :  { %1606 = dma.done.wait [#allocation7], 32  }
 0x17d   :  { %1607 = vsyncadd [#allocation7], 4294967264 }
 0x17e   :  { %988 = vsyncpa [#allocation3], 1 }
 0x17f   :  { %989 = vsyncpa [#allocation4], 1 }
 0x180   :  { %990 = vsyncpa [#allocation7], 1 }

</bundles_post_ra>
